<compile_context>
chip_gen: v5e
topology: v5e:2x2
jax: 0.10.0
libtpu: 0.0.40
codegen_flags: <defaults>
</compile_context>

<pallas_src>
import jax
import jax.numpy as jnp
from jax import lax
from jax.experimental import pallas as pl
from jax.experimental.pallas import tpu as pltpu


def _round_up(x, m):
    return ((x + m - 1) // m) * m


def encoder_kernel(self_ref, adj_ref, feat_ref, w_ref, out_ref, comb_ref):
    # self_ref : [Nt, F_pad]        self node features for this N tile
    # adj_ref  : [Nt, Vt]           row-normalized adjacency tile
    # feat_ref : [Vt, F_pad]        feature-table tile
    # w_ref    : [E_pad, 2*F_pad]   encoder weight ([W_self | W_neigh], padded)
    # out_ref  : [Nt, E_pad]        relu(combined @ W.T) tile (fp32)
    # comb_ref : [Nt, 2*F_pad] fp32 scratch: [ self | accumulated neigh ]
    vi = pl.program_id(1)
    nv = pl.num_programs(1)
    f_pad = self_ref.shape[1]

    # Mean-aggregation partial sum for this V tile (MXU, fp32 accumulation).
    partial = jnp.dot(adj_ref[...], feat_ref[...],
                      preferred_element_type=jnp.float32)

    @pl.when(vi == 0)
    def _init():
        comb_ref[:, :f_pad] = self_ref[...].astype(jnp.float32)
        comb_ref[:, f_pad:] = partial

    @pl.when(vi > 0)
    def _accum():
        comb_ref[:, f_pad:] += partial

    @pl.when(vi == nv - 1)
    def _finalize():
        combined = comb_ref[...].astype(w_ref.dtype)
        # relu(combined @ W.T) with no in-kernel transpose: contract the
        # feature axis (axis 1) of both operands -> [Nt, E_pad].
        out = lax.dot_general(
            combined, w_ref[...],
            dimension_numbers=(((1,), (1,)), ((), ())),
            preferred_element_type=jnp.float32,
        )
        out_ref[...] = jnp.maximum(out, 0.0).astype(out_ref.dtype)


def encoder_forward(self_feats, adj_norm, features, weight, *,
                    nt=256, vt=512, compute_dtype=jnp.float32):
    """relu(W @ cat(self_feats, A_norm @ X).T), returned as [embed_dim, batch]."""
    n, f = self_feats.shape
    v, f2 = features.shape
    e, two_f = weight.shape
    assert f2 == f and two_f == 2 * f
    assert adj_norm.shape == (n, v)

    # Padded / tiled sizes (lane dims -> 128 multiples, sublane -> 8 multiples).
    f_pad = _round_up(f, 128)
    e_pad = _round_up(e, 128)
    nt = min(nt, _round_up(n, 8))
    n_pad = _round_up(n, nt)
    vt = min(vt, _round_up(v, 128))
    v_pad = _round_up(v, vt)

    def pad2(x, rows, cols):
        return jnp.pad(x, ((0, rows - x.shape[0]), (0, cols - x.shape[1])))

    self_p = pad2(self_feats, n_pad, f_pad).astype(compute_dtype)
    adj_p = pad2(adj_norm, n_pad, v_pad).astype(compute_dtype)
    feat_p = pad2(features, v_pad, f_pad).astype(compute_dtype)
    # Pad each half of W separately so columns line up with [self_pad | neigh_pad].
    w_p = jnp.concatenate(
        [pad2(weight[:, :f], e_pad, f_pad), pad2(weight[:, f:], e_pad, f_pad)],
        axis=1).astype(compute_dtype)

    grid = (n_pad // nt, v_pad // vt)

    itemsize = jnp.dtype(compute_dtype).itemsize
    # Double-buffered input tiles + resident weight + output tile + fp32 scratch.
    tile_bytes = (2 * (nt * vt + vt * f_pad + nt * f_pad + e_pad * 2 * f_pad) * itemsize
                  + 2 * nt * e_pad * 4
                  + nt * 2 * f_pad * 4)
    vmem_limit = int(min(48 * 1024 * 1024, max(4 * 1024 * 1024, 2 * tile_bytes)))

    flops = 2 * n_pad * v_pad * f_pad + 2 * n_pad * (2 * f_pad) * e_pad
    bytes_accessed = ((n_pad * f_pad + n_pad * v_pad + v_pad * f_pad
                       + e_pad * 2 * f_pad) * itemsize
                      + n_pad * e_pad * 4)

    out_padded = pl.pallas_call(
        encoder_kernel,
        out_shape=jax.ShapeDtypeStruct((n_pad, e_pad), jnp.float32),
        grid_spec=pltpu.PrefetchScalarGridSpec(
            num_scalar_prefetch=0,
            grid=grid,
            in_specs=[
                pl.BlockSpec((nt, f_pad), lambda i, k: (i, 0)),       # self
                pl.BlockSpec((nt, vt), lambda i, k: (i, k)),          # adj
                pl.BlockSpec((vt, f_pad), lambda i, k: (k, 0)),       # features
                pl.BlockSpec((e_pad, 2 * f_pad), lambda i, k: (0, 0)),  # weight
            ],
            out_specs=pl.BlockSpec((nt, e_pad), lambda i, k: (i, 0)),
            scratch_shapes=[pltpu.VMEM((nt, 2 * f_pad), jnp.float32)],
        ),
        compiler_params=pltpu.CompilerParams(
            dimension_semantics=("parallel", "arbitrary"),
            vmem_limit_bytes=vmem_limit,
        ),
        cost_estimate=pl.CostEstimate(
            flops=flops, transcendentals=0, bytes_accessed=bytes_accessed),
    )(self_p, adj_p, feat_p, w_p)

    # Slice off padding and match PyTorch's `weight.mm(combined.t())` layout.
    return out_padded[:n, :e].T


def reference_forward(self_feats, adj_norm, features, weight):
    neigh = adj_norm @ features
    combined = jnp.concatenate([self_feats, neigh], axis=1)
    return jnp.maximum(weight @ combined.T, 0.0)


if __name__ == "__main__":
    key = jax.random.PRNGKey(0)
    k_feat, k_adj, k_w, k_nodes = jax.random.split(key, 4)

    num_nodes = 64     # size of the graph / feature table
    feat_dim = 32
    embed_dim = 16
    batch = 8          # number of nodes in the forward batch

    # Feature table (the nn.Embedding / features lookup table).
    features = jax.random.normal(k_feat, (num_nodes, feat_dim), dtype=jnp.float32)

    # Batch of node ids.
    nodes = jax.random.randint(k_nodes, (batch,), 0, num_nodes)

    # Dense mean-aggregation mask standing in for adj_lists + neighbor sampling:
    # TODO(synk): python-set neighbor sampling from adj_lists is host-side glue;
    # it is represented here as a dense row-normalized mask.
    adj = (jax.random.uniform(k_adj, (batch, num_nodes)) < 0.15).astype(jnp.float32)
    adj = adj.at[jnp.arange(batch), nodes].set(1.0)  # ensure non-empty neighborhood
    adj_norm = adj / jnp.sum(adj, axis=1, keepdims=True)

    # Xavier-uniform init for weight [embed_dim, 2*feat_dim].
    fan_in, fan_out = 2 * feat_dim, embed_dim
    bound = (6.0 / (fan_in + fan_out)) ** 0.5
    weight = jax.random.uniform(
        k_w, (embed_dim, 2 * feat_dim), minval=-bound, maxval=bound,
        dtype=jnp.float32)

    # Embedding lookup (glue, plain JAX gather).
    self_feats = features[nodes]

    ref = reference_forward(self_feats, adj_norm, features, weight)

    # fp32 path (exact-equivalent math, tight tolerance).
    out_f32 = jax.block_until_ready(
        encoder_forward(self_feats, adj_norm, features, weight,
                        compute_dtype=jnp.float32))
    assert out_f32.shape == (embed_dim, batch)
    assert jnp.allclose(out_f32, ref, atol=1e-4, rtol=1e-4)

    # bf16 MXU path (v6e/v7x-friendly: bf16 operands, fp32 accumulation).
    out_bf16 = jax.block_until_ready(
        encoder_forward(self_feats, adj_norm, features, weight,
                        compute_dtype=jnp.bfloat16))
    assert out_bf16.shape == (embed_dim, batch)
    assert jnp.allclose(out_bf16, ref, atol=5e-2, rtol=5e-2)

    print("KERNEL_OK")
</pallas_src>

<mosaic_0001>
module attributes {stable_mosaic.version = 11 : i64} {
  func.func @encoder_kernel(%arg0: i32, %arg1: i32, %arg2: memref<8x128xf32, #tpu.memory_space<vmem>>, %arg3: memref<8x128xf32, #tpu.memory_space<vmem>>, %arg4: memref<128x128xf32, #tpu.memory_space<vmem>>, %arg5: memref<128x256xf32, #tpu.memory_space<vmem>>, %arg6: memref<8x128xf32, #tpu.memory_space<vmem>>, %arg7: memref<8x256xf32, #tpu.memory_space<vmem>>) attributes {dimension_semantics = [#tpu.dimension_semantics<parallel>, #tpu.dimension_semantics<arbitrary>], iteration_bounds = array<i64: 1, 1>, scalar_prefetch = 0 : i64, scratch_operands = 1 : i64, tpu.core_type = #tpu.core_type<tc>, window_params = [{transform_indices = @transform_0, window_bounds = array<i64: 8, 128>}, {transform_indices = @transform_1, window_bounds = array<i64: 8, 128>}, {transform_indices = @transform_2, window_bounds = array<i64: 128, 128>}, {pipeline_mode = #tpu.pipeline_mode<synchronous>, transform_indices = @transform_3, window_bounds = array<i64: 128, 256>}, {transform_indices = @transform_4, window_bounds = array<i64: 8, 128>}]} {
    %c0 = arith.constant 0 : index
    %c0_0 = arith.constant 0 : index
    %0 = vector.load %arg3[%c0, %c0_0] : memref<8x128xf32, #tpu.memory_space<vmem>>, vector<8x128xf32>
    %c0_1 = arith.constant 0 : index
    %c0_2 = arith.constant 0 : index
    %1 = vector.load %arg4[%c0_1, %c0_2] : memref<128x128xf32, #tpu.memory_space<vmem>>, vector<128x128xf32>
    %cst = arith.constant dense<0.000000e+00> : vector<8x128xf32>
    %2 = tpu.matmul %0, %1, %cst {dimension_numbers = #tpu.dot_dimension_numbers<[1], [0], [0], [1], [0, 0, 1, 1], [], []>} : vector<8x128xf32>, vector<128x128xf32>, vector<8x128xf32> -> vector<8x128xf32>
    %c0_i32 = arith.constant 0 : i32
    %3 = arith.cmpi eq, %arg1, %c0_i32 : i32
    %4 = arith.extui %3 : i1 to i32
    %c0_i32_3 = arith.constant 0 : i32
    %5 = arith.cmpi ne, %4, %c0_i32_3 : i32
    scf.if %5 {
      %c0_8 = arith.constant 0 : index
      %c0_9 = arith.constant 0 : index
      %12 = vector.load %arg2[%c0_8, %c0_9] : memref<8x128xf32, #tpu.memory_space<vmem>>, vector<8x128xf32>
      %c0_10 = arith.constant 0 : index
      %c0_11 = arith.constant 0 : index
      %13 = vector.load %arg7[%c0_10, %c0_11] : memref<8x256xf32, #tpu.memory_space<vmem>>, vector<8x128xf32>
      tpu.vector_store %arg7[%c0_10, %c0_11], %12 {strides = array<i32>} : memref<8x256xf32, #tpu.memory_space<vmem>>, vector<8x128xf32>,
      %c0_12 = arith.constant 0 : index
      %c128 = arith.constant 128 : index
      %14 = vector.load %arg7[%c0_12, %c128] : memref<8x256xf32, #tpu.memory_space<vmem>>, vector<8x128xf32>
      tpu.vector_store %arg7[%c0_12, %c128], %2 {strides = array<i32>} : memref<8x256xf32, #tpu.memory_space<vmem>>, vector<8x128xf32>,
    } else {
    }
    %c0_i32_4 = arith.constant 0 : i32
    %6 = arith.cmpi sgt, %arg1, %c0_i32_4 : i32
    %7 = arith.extui %6 : i1 to i32
    %c0_i32_5 = arith.constant 0 : i32
    %8 = arith.cmpi ne, %7, %c0_i32_5 : i32
    scf.if %8 {
      %c0_8 = arith.constant 0 : index
      %c128 = arith.constant 128 : index
      %12 = vector.load %arg7[%c0_8, %c128] : memref<8x256xf32, #tpu.memory_space<vmem>>, vector<8x128xf32>
      %13 = arith.addf %12, %2 : vector<8x128xf32>
      %c0_9 = arith.constant 0 : index
      %c128_10 = arith.constant 128 : index
      %14 = vector.load %arg7[%c0_9, %c128_10] : memref<8x256xf32, #tpu.memory_space<vmem>>, vector<8x128xf32>
      tpu.vector_store %arg7[%c0_9, %c128_10], %13 {strides = array<i32>} : memref<8x256xf32, #tpu.memory_space<vmem>>, vector<8x128xf32>,
    } else {
    }
    %c0_i32_6 = arith.constant 0 : i32
    %9 = arith.cmpi eq, %arg1, %c0_i32_6 : i32
    %10 = arith.extui %9 : i1 to i32
    %c0_i32_7 = arith.constant 0 : i32
    %11 = arith.cmpi ne, %10, %c0_i32_7 : i32
    scf.if %11 {
      %c0_8 = arith.constant 0 : index
      %c0_9 = arith.constant 0 : index
      %12 = vector.load %arg7[%c0_8, %c0_9] : memref<8x256xf32, #tpu.memory_space<vmem>>, vector<8x256xf32>
      %c0_10 = arith.constant 0 : index
      %c0_11 = arith.constant 0 : index
      %13 = vector.load %arg5[%c0_10, %c0_11] : memref<128x256xf32, #tpu.memory_space<vmem>>, vector<128x256xf32>
      %cst_12 = arith.constant dense<0.000000e+00> : vector<8x128xf32>
      %14 = tpu.matmul %12, %13, %cst_12 {dimension_numbers = #tpu.dot_dimension_numbers<[1], [1], [0], [0], [0, 0, 1, 0], [], []>} : vector<8x256xf32>, vector<128x256xf32>, vector<8x128xf32> -> vector<8x128xf32>
      %cst_13 = arith.constant 0.000000e+00 : f32
      %15 = vector.broadcast %cst_13 : f32 to vector<8x128xf32>
      %16 = arith.maximumf %14, %15 : vector<8x128xf32>
      %c0_14 = arith.constant 0 : index
      %c0_15 = arith.constant 0 : index
      %17 = vector.load %arg6[%c0_14, %c0_15] : memref<8x128xf32, #tpu.memory_space<vmem>>, vector<8x128xf32>
      tpu.vector_store %arg6[%c0_14, %c0_15], %16 {strides = array<i32>} : memref<8x128xf32, #tpu.memory_space<vmem>>, vector<8x128xf32>,
    } else {
    }
    return
  }
  func.func @transform_0(%arg0: i32, %arg1: i32) -> (i32, i32) {
    %c0_i32 = arith.constant 0 : i32
    %c0_i32_0 = arith.constant 0 : i32
    return %arg0, %c0_i32 : i32, i32
  }
  func.func @transform_1(%arg0: i32, %arg1: i32) -> (i32, i32) {
    %c0_i32 = arith.constant 0 : i32
    return %arg0, %arg1 : i32, i32
  }
  func.func @transform_2(%arg0: i32, %arg1: i32) -> (i32, i32) {
    %c0_i32 = arith.constant 0 : i32
    %c0_i32_0 = arith.constant 0 : i32
    return %arg1, %c0_i32 : i32, i32
  }
  func.func @transform_3(%arg0: i32, %arg1: i32) -> (i32, i32) {
    %c0_i32 = arith.constant 0 : i32
    %c0_i32_0 = arith.constant 0 : i32
    %c0_i32_1 = arith.constant 0 : i32
    return %c0_i32, %c0_i32_0 : i32, i32
  }
  func.func @transform_4(%arg0: i32, %arg1: i32) -> (i32, i32) {
    %c0_i32 = arith.constant 0 : i32
    %c0_i32_0 = arith.constant 0 : i32
    return %arg0, %c0_i32 : i32, i32
  }
}

</mosaic_0001>

<bundles_post_ra>
// kernel: tpu_custom_call.1
= control target key start
LH: loop header
LB: loop body
LE: loop exit
PB: predicated region body
PF: predicated region fallthrough
CT: control target
= control target key end

     0   :  { %9 = vsyncpa [#allocation4], 0  ;;  %s412_s0 = inlined_call_operand.hbm [shape: f32[8,128], index: 0, kind: input, shape index: {}]   ;;  %s413_s1 = inlined_call_operand.hbm [shape: f32[8,128], index: 1, kind: input, shape index: {}]   ;;  %s414_s2 = inlined_call_operand.hbm [shape: f32[128,128], index: 2, kind: input, shape index: {}]   ;;  %s415_s3 = inlined_call_operand.hbm [shape: f32[128,256], index: 3, kind: input, shape index: {}]   ;;  %s416_s4 = inlined_call_operand.hbm [shape: f32[8,128], index: 4, kind: output, shape index: {}]  }
   0x1   :  { %10 = vsyncpa [#allocation7], 0 }
   0x2   :  { %11 = vsyncpa [#allocation10], 0  ;;  %s29_s17 = sshll.u32 %s413_s1, 4  ;;  %s30_s17 = int_to_ptr.hbm [resolvable:$true] %s29_s17 }
   0x3   :  { %12 = vsyncpa [#allocation5], 0  ;;  %s363_s18 = smov [#allocation6]   ;;  %s18_s22 = sshll.u32 %s412_s0, 4  ;;  %s19_s22 = int_to_ptr.hbm [resolvable:$true] %s18_s22 }
   0x4   :  { %s31_s19 = sshll.u32 %s363_s18, 4  ;;  %s364_s23 = smov [#allocation3]   ;;  %s32_s19 = int_to_ptr.vmem [resolvable:$true] %s31_s19 }
   0x5   :  { %34 = dma.hbm_to_vmem [thread:$0]  %s30_s17, 128, %s32_s19, [#allocation7]  }
   0x6   :  { %s20_s24 = sshll.u32 %s364_s23, 4  ;;  %s39_s27 = sshll.u32 %s414_s2, 4  ;;  %s21_s24 = int_to_ptr.vmem [resolvable:$true] %s20_s24  ;;  %s40_s27 = int_to_ptr.hbm [resolvable:$true] %s39_s27 }
   0x7   :  { %23 = dma.hbm_to_vmem [thread:$0]  %s19_s22, 128, %s21_s24, [#allocation4]  }
   0x8   :  { %s365_s1 = smov [#allocation8]   ;;  %s52_s5 = sshll.u32 %s415_s3, 4  ;;  %s53_s5 = int_to_ptr.hbm [resolvable:$true] %s52_s5 }
   0x9   :  { %s41_s28 = sshll.u32 %s365_s1, 4  ;;  %s366_s6 = smov 128   ;;  %s42_s28 = int_to_ptr.vmem [resolvable:$true] %s41_s28 }
   0xa   :  { %s367_s0 = smov 8   ;;  %s368_s7 = smov [#allocation9]  }
   0xb   :  { %47 = dma.hbm_to_vmem [thread:$0]  %s40_s27, 2048, %s42_s28, [#allocation7], %s366_s6, %s366_s6, %s367_s0  }
   0xc   :  { %s54_s8 = sshll.u32 %s368_s7, 4  ;;  %s369_s9 = smov 256   ;;  %s55_s8 = int_to_ptr.vmem [resolvable:$true] %s54_s8 }
   0xd   :  { %s370_s10 = smov 16  }
   0xe   :  { %60 = dma.hbm_to_vmem [thread:$0]  %s53_s5, 4096, %s55_s8, [#allocation10], %s369_s9, %s369_s9, %s370_s10  }
   0xf   :  { %355 = dma.done.wait [#allocation4], 128  }
  0x10   :  { %356 = vsyncadd [#allocation4], 4294967168 }
  0x11   :  { %357 = dma.done.wait [#allocation7], 2176  }
  0x12   :  { %358 = vsyncadd [#allocation7], 4294965120 }
  0x13   :  { %359 = dma.done.wait [#allocation10], 4096  }
  0x14   :  { %360 = vsyncadd [#allocation10], 4294963200  ;;  %v93_v0 = vld [vmem:[#allocation8 + $0x78] sm:$0xff]  ;;  %v92_v1 = vld [vmem:[#allocation8 + $0x70] sm:$0xff]  ;;  %s371_s2 = smov [#allocation11]   ;;  %s214_s13 = sshll.u32 %s416_s4, 4  ;;  %s215_s13 = int_to_ptr.hbm [resolvable:$true] %s214_s13 }
  0x15   :  { %94 = vmatpush.msra.mxu0 %v93_v0  ;;  %v91_v2 = vld [vmem:[#allocation8 + $0x68] sm:$0xff]  ;;  %v90_v3 = vld [vmem:[#allocation8 + $0x60] sm:$0xff]  ;;  %v164_v4 = vld [vmem:[#allocation9 + $0xf8] sm:$0xff]  ;;  %s212_s3 = sshll.u32 %s371_s2, 4  ;;  %s213_s3 = int_to_ptr.vmem [resolvable:$true] %s212_s3 }
  0x16   :  { %v89_v5 = vld [vmem:[#allocation8 + $0x58] sm:$0xff]  ;;  %185 = vmatpush.xpose.msra.mxu2 %v164_v4  ;;  %v163_v6 = vld [vmem:[#allocation9 + $0xf0] sm:$0xff]  ;;  %v162_v7 = vld [vmem:[#allocation9 + $0xe8] sm:$0xff] }
  0x17   :  { %95 = vmatpush.msra.mxu0 %v92_v1  ;;  %165 = vmatpush.xpose.msra.mxu1 %v163_v6  ;;  %v88_v8 = vld [vmem:[#allocation8 + $0x50] sm:$0xff]  ;;  %v161_v9 = vld [vmem:[#allocation9 + $0xe0] sm:$0xff]  ;;  %v87_v10 = vld [vmem:[#allocation8 + $0x48] sm:$0xff] }
  0x18   :  { %v160_v11 = vld [vmem:[#allocation9 + $0xd8] sm:$0xff]  ;;  %v86_v12 = vld [vmem:[#allocation8 + $0x40] sm:$0xff]  ;;  %v159_v13 = vld [vmem:[#allocation9 + $0xd0] sm:$0xff] }
  0x19   :  { %96 = vmatpush.msra.mxu0 %v91_v2  ;;  %v85_v14 = vld [vmem:[#allocation8 + $0x38] sm:$0xff]  ;;  %v158_v15 = vld [vmem:[#allocation9 + $0xc8] sm:$0xff]  ;;  %v84_v16 = vld [vmem:[#allocation8 + $0x30] sm:$0xff] }
  0x1a   :  { %186 = vmatpush.xpose.msra.mxu2 %v162_v7  ;;  %v157_v17 = vld [vmem:[#allocation9 + $0xc0] sm:$0xff]  ;;  %v83_v18 = vld [vmem:[#allocation8 + $0x28] sm:$0xff]  ;;  %v156_v19 = vld [vmem:[#allocation9 + $0xb8] sm:$0xff] }
  0x1b   :  { %97 = vmatpush.msra.mxu0 %v90_v3  ;;  %166 = vmatpush.xpose.msra.mxu1 %v161_v9  ;;  %v82_v20 = vld [vmem:[#allocation8 + $0x20] sm:$0xff]  ;;  %v155_v21 = vld [vmem:[#allocation9 + $0xb0] sm:$0xff]  ;;  %v81_v22 = vld [vmem:[#allocation8 + $0x18] sm:$0xff] }
  0x1c   :  { %v154_v23 = vld [vmem:[#allocation9 + $0xa8] sm:$0xff]  ;;  %v80_v24 = vld [vmem:[#allocation8 + $0x10] sm:$0xff]  ;;  %v153_v25 = vld [vmem:[#allocation9 + $0xa0] sm:$0xff] }
  0x1d   :  { %98 = vmatpush.msra.mxu0 %v89_v5  ;;  %v79_v26 = vld [vmem:[#allocation8 + $0x8] sm:$0xff]  ;;  %v152_v27 = vld [vmem:[#allocation9 + $0x98] sm:$0xff]  ;;  %v78_v28 = vld [vmem:[#allocation8] sm:$0xff] }
  0x1e   :  { %187 = vmatpush.xpose.msra.mxu2 %v160_v11  ;;  %v151_v29 = vld [vmem:[#allocation9 + $0x90] sm:$0xff]  ;;  %v77_v30 = vld [vmem:[#allocation6] sm:$0xff]  ;;  %v150_v31 = vld [vmem:[#allocation9 + $0x88] sm:$0xff] }
  0x1f   :  { %99 = vmatpush.msra.mxu0 %v88_v8  ;;  %167 = vmatpush.xpose.msra.mxu1 %v159_v13  ;;  %v149_v32 = vld [vmem:[#allocation9 + $0x80] sm:$0xff]  ;;  %v148_v33 = vld [vmem:[#allocation9 + $0x78] sm:$0xff]  ;;  %v147_v34 = vld [vmem:[#allocation9 + $0x70] sm:$0xff] }
  0x20   :  { %v146_v35 = vld [vmem:[#allocation9 + $0x68] sm:$0xff]  ;;  %v145_v36 = vld [vmem:[#allocation9 + $0x60] sm:$0xff]  ;;  %v144_v37 = vld [vmem:[#allocation9 + $0x58] sm:$0xff] }
  0x21   :  { %100 = vmatpush.msra.mxu0 %v87_v10  ;;  %v143_v38 = vld [vmem:[#allocation9 + $0x50] sm:$0xff]  ;;  %v142_v39 = vld [vmem:[#allocation9 + $0x48] sm:$0xff]  ;;  %v141_v40 = vld [vmem:[#allocation9 + $0x40] sm:$0xff] }
  0x22   :  { %188 = vmatpush.xpose.msra.mxu2 %v158_v15  ;;  %v140_v41 = vld [vmem:[#allocation9 + $0x38] sm:$0xff]  ;;  %v139_v42 = vld [vmem:[#allocation9 + $0x30] sm:$0xff]  ;;  %v138_v43 = vld [vmem:[#allocation9 + $0x28] sm:$0xff] }
  0x23   :  { %101 = vmatpush.msra.mxu0 %v86_v12  ;;  %168 = vmatpush.xpose.msra.mxu1 %v157_v17  ;;  %v137_v44 = vld [vmem:[#allocation9 + $0x20] sm:$0xff]  ;;  %v136_v45 = vld [vmem:[#allocation9 + $0x18] sm:$0xff]  ;;  %v134_v46 = vld [vmem:[#allocation9 + $0x8] sm:$0xff] }
  0x24   :  { %v135_v47 = vld [vmem:[#allocation9 + $0x10] sm:$0xff]  ;;  %v133_v48 = vld [vmem:[#allocation9] sm:$0xff] }
  0x25   :  { %102 = vmatpush.msra.mxu0 %v85_v14  ;;  %v118_v49 = vld [vmem:[#allocation3] sm:$0xff] }
  0x26   :  { %189 = vmatpush.xpose.msra.mxu2 %v156_v19 }
  0x27   :  { %103 = vmatpush.msra.mxu0 %v84_v16  ;;  %169 = vmatpush.xpose.msra.mxu1 %v155_v21 }
  0x29   :  { %104 = vmatpush.msra.mxu0 %v83_v18 }
  0x2a   :  { %190 = vmatpush.xpose.msra.mxu2 %v154_v23 }
  0x2b   :  { %105 = vmatpush.msra.mxu0 %v82_v20  ;;  %170 = vmatpush.xpose.msra.mxu1 %v153_v25 }
  0x2d   :  { %106 = vmatpush.msra.mxu0 %v81_v22 }
  0x2e   :  { %191 = vmatpush.xpose.msra.mxu2 %v152_v27 }
  0x2f   :  { %107 = vmatpush.msra.mxu0 %v80_v24  ;;  %171 = vmatpush.xpose.msra.mxu1 %v151_v29 }
  0x31   :  { %108 = vmatpush.msra.mxu0 %v79_v26 }
  0x32   :  { %192 = vmatpush.xpose.msra.mxu2 %v150_v31 }
  0x33   :  { %109 = vmatpush.msra.mxu0 %v78_v28  ;;  %172 = vmatpush.xpose.msra.mxu1 %v149_v32 }
  0x34   :  { %110 = vmatmul.f32.vlgmr.msra.gmra.mxu0 %v77_v30 }
  0x36   :  { %193 = vmatpush.xpose.msra.mxu2 %v148_v33 }
  0x37   :  { %173 = vmatpush.xpose.msra.mxu1 %v147_v34 }
  0x3a   :  { %194 = vmatpush.xpose.msra.mxu2 %v146_v35 }
  0x3b   :  { %174 = vmatpush.xpose.msra.mxu1 %v145_v36 }
  0x3e   :  { %195 = vmatpush.xpose.msra.mxu2 %v144_v37 }
  0x3f   :  { %175 = vmatpush.xpose.msra.mxu1 %v143_v38 }
  0x42   :  { %196 = vmatpush.xpose.msra.mxu2 %v142_v39 }
  0x43   :  { %176 = vmatpush.xpose.msra.mxu1 %v141_v40 }
  0x46   :  { %197 = vmatpush.xpose.msra.mxu2 %v140_v41 }
  0x47   :  { %177 = vmatpush.xpose.msra.mxu1 %v139_v42 }
  0x4a   :  { %198 = vmatpush.xpose.msra.mxu2 %v138_v43 }
  0x4b   :  { %178 = vmatpush.xpose.msra.mxu1 %v137_v44 }
  0x4e   :  { %199 = vmatpush.xpose.msra.mxu2 %v136_v45 }
  0x4f   :  { %179 = vmatpush.xpose.msra.mxu1 %v135_v47 }
  0x52   :  { %200 = vmatpush.xpose.msra.mxu2 %v134_v46 }
  0x53   :  { %180 = vmatpush.xpose.msra.mxu1 %v133_v48 }
  0x56   :  { %181 = vmatmul.f32.vlgmr.msra.gmra.mxu1 %v118_v49 }
  0xb1   :  { %v111_v50 = vpop.f32.mrf.mxu0 }
  0xb2   :  { %201 = vmatmul.f32.vlgmr.msra.gmra.mxu2 %v111_v50 }
  0xd3   :  { %v182_v51 = vpop.f32.mrf.mxu1 }
 0x135   :  { %v202_v52 = vpop.f32.mrf.mxu2 }
 0x136   :  { %v203_v53 = vadd.f32 %v202_v52, %v182_v51 }
 0x138   :  { %v205_v54 = vmax.f32 %v203_v53, 0.0 }
 0x13a   :  { %206 = vst [vmem:[#allocation11] sm:$0xff] %v205_v54 }
 0x13b   :  { %217 = dma.vmem_to_hbm [thread:$0]  %s213_s3, 128, %s215_s13, [#allocation5]  }
 0x13c   :  { %361 = dma.done.wait [#allocation5], 128  }
 0x13d   :  { %362 = vsyncadd [#allocation5], 4294967168 }
 0x13e   :  { %222 = vsyncpa [#allocation4], 1 }
 0x13f   :  { %223 = vsyncpa [#allocation7], 1 }
 0x140   :  { %224 = vsyncpa [#allocation10], 1 }
 0x141   :  { %225 = vsyncpa [#allocation5], 1 }

</bundles_post_ra>
